<compile_context>
chip_gen: v6e
topology: v6e:2x2x1
jax: 0.10.0
libtpu: 0.0.40
codegen_flags: <defaults>
</compile_context>

<pallas_src>
import jax
import jax.numpy as jnp
from jax import lax
from jax.experimental import pallas as pl
from jax.experimental.pallas import tpu as pltpu

NEG_SLOPE = 0.01  # nn.LeakyReLU default negative_slope


def agent_kernel(xT_ref, w1_ref, b1_ref, w2_ref, b2_ref, o_ref):
    # fc1: (H, I) @ (I, Bt) -> (H, Bt).  Batch on lanes, K on lhs-lanes /
    # rhs-sublanes (canonical MXU feed).
    h = lax.dot_general(
        w1_ref[...], xT_ref[...],
        dimension_numbers=(((1,), (0,)), ((), ())),
        preferred_element_type=jnp.float32,
    ) + b1_ref[...]                       # (H, Bt) + (H, 1) lane-broadcast
    # LeakyReLU(negative_slope=0.01): one mul + max on the VALU.
    h = jnp.maximum(h, NEG_SLOPE * h)
    # fc2: (O, H) @ (H, Bt) -> (O, Bt)
    logits = lax.dot_general(
        w2_ref[...], h,
        dimension_numbers=(((1,), (0,)), ((), ())),
        preferred_element_type=jnp.float32,
    ) + b2_ref[...]                       # (O, Bt) + (O, 1)
    # Softmax over the class axis (axis 0 here == dim=1 of the original (B, O)
    # layout).  Exact divide so each probability row sums to 1.
    m = jnp.max(logits, axis=0, keepdims=True)
    e = jnp.exp(logits - m)
    s = jnp.sum(e, axis=0, keepdims=True)
    o_ref[...] = (e / s).astype(o_ref.dtype)


def agent_forward(x, w1, b1, w2, b2, *, batch_tile=1024):
    """Forward pass of Agent.

    x : (B, I) float32
    w1: (H, I) PyTorch (out, in) layout   b1: (H,), (1, H) or (H, 1)
    w2: (O, H)                            b2: (O,), (1, O) or (O, 1)
    Returns (B, O) float32 softmax probabilities.
    """
    B, I = x.shape
    H = w1.shape[0]
    O = w2.shape[0]

    # Biases in (out, 1) layout so they broadcast along the lane (batch) axis.
    b1 = jnp.asarray(b1).reshape(H, 1)
    b2 = jnp.asarray(b2).reshape(O, 1)

    # One-time transpose outside the kernel: batch onto lanes.
    xT = x.T  # (I, B)

    # Tile choice: small batches -> one 128-lane-aligned tile; large batches ->
    # batch_tile-wide steps (>= 2 grid steps so v7x megacore can shard them).
    if B <= batch_tile:
        bt = max(128, ((B + 127) // 128) * 128)
    else:
        bt = batch_tile

    num_tiles = pl.cdiv(B, bt)
    B_pad = num_tiles * bt
    if B_pad != B:
        # Zero-padded tail columns still produce a valid softmax (uniform-ish)
        # and are sliced off below; no masking needed in the kernel.
        xT = jnp.pad(xT, ((0, 0), (0, B_pad - B)))

    outT = pl.pallas_call(
        agent_kernel,
        out_shape=jax.ShapeDtypeStruct((O, B_pad), jnp.float32),
        grid_spec=pltpu.PrefetchScalarGridSpec(
            num_scalar_prefetch=0,
            grid=(num_tiles,),
            in_specs=[
                pl.BlockSpec((I, bt), lambda i: (0, i)),   # x^T tile (lane-dense)
                pl.BlockSpec((H, I), lambda i: (0, 0)),    # w1, VMEM-resident
                pl.BlockSpec((H, 1), lambda i: (0, 0)),    # b1
                pl.BlockSpec((O, H), lambda i: (0, 0)),    # w2
                pl.BlockSpec((O, 1), lambda i: (0, 0)),    # b2
            ],
            out_specs=pl.BlockSpec((O, bt), lambda i: (0, i)),  # lane-dense out
        ),
        compiler_params=pltpu.CompilerParams(
            dimension_semantics=("parallel",)),
    )(xT, w1, b1, w2, b2)

    # One transpose back + slice off the padded columns (outside the kernel).
    return outT[:, :B].T


def agent_forward_ref(x, w1, b1, w2, b2):
    """Pure-JAX reference (mirrors the PyTorch module exactly)."""
    h = x @ w1.T + jnp.asarray(b1).reshape(1, -1)
    h = jnp.where(h > 0, h, NEG_SLOPE * h)
    logits = h @ w2.T + jnp.asarray(b2).reshape(1, -1)
    return jax.nn.softmax(logits, axis=1)


if __name__ == "__main__":
    # Small shapes consistent with the module: batch=8, input=16, hidden=32, output=4
    B, INPUT, HIDDEN, OUTPUT = 8, 16, 32, 4

    key = jax.random.PRNGKey(0)
    kx, k1, k2, k3, k4, kx2 = jax.random.split(key, 6)

    x = jax.random.normal(kx, (B, INPUT), dtype=jnp.float32)
    # Params created once "at init": weights in PyTorch (out, in) layout,
    # biases 1-D (promoted to (out, 1) inside the wrapper).
    w1 = jax.random.normal(k1, (HIDDEN, INPUT), dtype=jnp.float32) * 0.1
    b1 = jax.random.normal(k2, (HIDDEN,), dtype=jnp.float32) * 0.1
    w2 = jax.random.normal(k3, (OUTPUT, HIDDEN), dtype=jnp.float32) * 0.1
    b2 = jax.random.normal(k4, (OUTPUT,), dtype=jnp.float32) * 0.1

    # --- small batch (pads to one 128-lane tile) ---
    out = jax.block_until_ready(agent_forward(x, w1, b1, w2, b2))
    ref = agent_forward_ref(x, w1, b1, w2, b2)
    assert out.shape == (B, OUTPUT)
    assert jnp.allclose(out, ref, atol=1e-4, rtol=1e-4), "mismatch vs reference"
    assert jnp.allclose(jnp.sum(out, axis=1), 1.0, atol=1e-5), "softmax rows must sum to 1"

    # --- larger batch, non-multiple of the tile (exercises cdiv grid + padded tail) ---
    B_BIG = 1000
    xb = jax.random.normal(kx2, (B_BIG, INPUT), dtype=jnp.float32)
    outb = jax.block_until_ready(agent_forward(xb, w1, b1, w2, b2, batch_tile=256))
    refb = agent_forward_ref(xb, w1, b1, w2, b2)
    assert outb.shape == (B_BIG, OUTPUT)
    assert jnp.allclose(outb, refb, atol=1e-4, rtol=1e-4), "tiled path mismatch vs reference"
    assert jnp.allclose(jnp.sum(outb, axis=1), 1.0, atol=1e-5), "tiled softmax rows must sum to 1"

    print("KERNEL_OK")
</pallas_src>

<mosaic_0001>
module attributes {stable_mosaic.version = 11 : i64} {
  func.func @agent_kernel(%arg0: i32, %arg1: memref<16x128xf32, #tpu.memory_space<vmem>>, %arg2: memref<32x16xf32, #tpu.memory_space<vmem>>, %arg3: memref<32x1xf32, #tpu.memory_space<vmem>>, %arg4: memref<4x32xf32, #tpu.memory_space<vmem>>, %arg5: memref<4x1xf32, #tpu.memory_space<vmem>>, %arg6: memref<4x128xf32, #tpu.memory_space<vmem>>) attributes {dimension_semantics = [#tpu.dimension_semantics<parallel>], iteration_bounds = array<i64: 1>, scalar_prefetch = 0 : i64, scratch_operands = 0 : i64, tpu.core_type = #tpu.core_type<tc>, window_params = [{transform_indices = @transform_0, window_bounds = array<i64: 16, 128>}, {pipeline_mode = #tpu.pipeline_mode<synchronous>, transform_indices = @transform_1, window_bounds = array<i64: 32, 16>}, {pipeline_mode = #tpu.pipeline_mode<synchronous>, transform_indices = @transform_2, window_bounds = array<i64: 32, 1>}, {pipeline_mode = #tpu.pipeline_mode<synchronous>, transform_indices = @transform_3, window_bounds = array<i64: 4, 32>}, {pipeline_mode = #tpu.pipeline_mode<synchronous>, transform_indices = @transform_4, window_bounds = array<i64: 4, 1>}, {transform_indices = @transform_5, window_bounds = array<i64: 4, 128>}]} {
    %c0 = arith.constant 0 : index
    %c0_0 = arith.constant 0 : index
    %0 = vector.load %arg2[%c0, %c0_0] : memref<32x16xf32, #tpu.memory_space<vmem>>, vector<32x16xf32>
    %c0_1 = arith.constant 0 : index
    %c0_2 = arith.constant 0 : index
    %1 = vector.load %arg1[%c0_1, %c0_2] : memref<16x128xf32, #tpu.memory_space<vmem>>, vector<16x128xf32>
    %cst = arith.constant dense<0.000000e+00> : vector<32x128xf32>
    %2 = tpu.matmul %0, %1, %cst {dimension_numbers = #tpu.dot_dimension_numbers<[1], [0], [0], [1], [0, 0, 1, 1], [], []>} : vector<32x16xf32>, vector<16x128xf32>, vector<32x128xf32> -> vector<32x128xf32>
    %c0_3 = arith.constant 0 : index
    %c0_4 = arith.constant 0 : index
    %3 = vector.load %arg3[%c0_3, %c0_4] : memref<32x1xf32, #tpu.memory_space<vmem>>, vector<32x1xf32>
    %4 = vector.broadcast %3 : vector<32x1xf32> to vector<32x128xf32>
    %5 = arith.addf %2, %4 : vector<32x128xf32>
    %cst_5 = arith.constant 0.00999999977 : f32
    %6 = vector.broadcast %cst_5 : f32 to vector<32x128xf32>
    %7 = arith.mulf %6, %5 : vector<32x128xf32>
    %8 = arith.maximumf %5, %7 : vector<32x128xf32>
    %c0_6 = arith.constant 0 : index
    %c0_7 = arith.constant 0 : index
    %9 = vector.load %arg4[%c0_6, %c0_7] : memref<4x32xf32, #tpu.memory_space<vmem>>, vector<4x32xf32>
    %cst_8 = arith.constant dense<0.000000e+00> : vector<4x128xf32>
    %10 = tpu.matmul %9, %8, %cst_8 {dimension_numbers = #tpu.dot_dimension_numbers<[1], [0], [0], [1], [0, 0, 1, 1], [], []>} : vector<4x32xf32>, vector<32x128xf32>, vector<4x128xf32> -> vector<4x128xf32>
    %c0_9 = arith.constant 0 : index
    %c0_10 = arith.constant 0 : index
    %11 = vector.load %arg5[%c0_9, %c0_10] : memref<4x1xf32, #tpu.memory_space<vmem>>, vector<4x1xf32>
    %12 = vector.broadcast %11 : vector<4x1xf32> to vector<4x128xf32>
    %13 = arith.addf %10, %12 : vector<4x128xf32>
    %cst_11 = arith.constant dense<0xFF800000> : vector<128xf32>
    %14 = vector.multi_reduction <maximumf>, %13, %cst_11 [0] : vector<4x128xf32> to vector<128xf32>
    %15 = vector.shape_cast %14 : vector<128xf32> to vector<1x128xf32>
    %16 = vector.broadcast %15 : vector<1x128xf32> to vector<4x128xf32>
    %17 = arith.subf %13, %16 : vector<4x128xf32>
    %18 = math.exp %17 : vector<4x128xf32>
    %cst_12 = arith.constant dense<0.000000e+00> : vector<128xf32>
    %19 = vector.multi_reduction <add>, %18, %cst_12 [0] : vector<4x128xf32> to vector<128xf32>
    %20 = vector.shape_cast %19 : vector<128xf32> to vector<1x128xf32>
    %21 = vector.broadcast %20 : vector<1x128xf32> to vector<4x128xf32>
    %22 = arith.divf %18, %21 : vector<4x128xf32>
    %c0_13 = arith.constant 0 : index
    %c0_14 = arith.constant 0 : index
    %23 = vector.load %arg6[%c0_13, %c0_14] : memref<4x128xf32, #tpu.memory_space<vmem>>, vector<4x128xf32>
    tpu.vector_store %arg6[%c0_13, %c0_14], %22 {strides = array<i32>} : memref<4x128xf32, #tpu.memory_space<vmem>>, vector<4x128xf32>,
    return
  }
  func.func @transform_0(%arg0: i32) -> (i32, i32) {
    %c0_i32 = arith.constant 0 : i32
    %c0_i32_0 = arith.constant 0 : i32
    return %c0_i32, %arg0 : i32, i32
  }
  func.func @transform_1(%arg0: i32) -> (i32, i32) {
    %c0_i32 = arith.constant 0 : i32
    %c0_i32_0 = arith.constant 0 : i32
    %c0_i32_1 = arith.constant 0 : i32
    return %c0_i32, %c0_i32_0 : i32, i32
  }
  func.func @transform_2(%arg0: i32) -> (i32, i32) {
    %c0_i32 = arith.constant 0 : i32
    %c0_i32_0 = arith.constant 0 : i32
    %c0_i32_1 = arith.constant 0 : i32
    return %c0_i32, %c0_i32_0 : i32, i32
  }
  func.func @transform_3(%arg0: i32) -> (i32, i32) {
    %c0_i32 = arith.constant 0 : i32
    %c0_i32_0 = arith.constant 0 : i32
    %c0_i32_1 = arith.constant 0 : i32
    return %c0_i32, %c0_i32_0 : i32, i32
  }
  func.func @transform_4(%arg0: i32) -> (i32, i32) {
    %c0_i32 = arith.constant 0 : i32
    %c0_i32_0 = arith.constant 0 : i32
    %c0_i32_1 = arith.constant 0 : i32
    return %c0_i32, %c0_i32_0 : i32, i32
  }
  func.func @transform_5(%arg0: i32) -> (i32, i32) {
    %c0_i32 = arith.constant 0 : i32
    %c0_i32_0 = arith.constant 0 : i32
    return %c0_i32, %arg0 : i32, i32
  }
}

</mosaic_0001>

<bundles_post_ra>
// kernel: tpu_custom_call.1
= control target key start
LH: loop header
LB: loop body
LE: loop exit
PB: predicated region body
PF: predicated region fallthrough
CT: control target
= control target key end

     0   :  { %vm51_vm0 = vcmask 130048   ;;  %v342_v4 = vmov 0   ;;  %s419_s0 = inlined_call_operand.vmem [shape: f32[16,128], index: 0, kind: input, shape index: {}]   ;;  %s420_s1 = inlined_call_operand.vmem [shape: f32[32,16], index: 1, kind: input, shape index: {}]   ;;  %s421_s2 = inlined_call_operand.vmem [shape: f32[32,1], index: 2, kind: input, shape index: {}]   ;;  %s422_s3 = inlined_call_operand.vmem [shape: f32[4,32], index: 3, kind: input, shape index: {}]   ;;  %s423_s4 = inlined_call_operand.vmem [shape: f32[4,1], index: 4, kind: input, shape index: {}]   ;;  %s424_s5 = inlined_call_operand.hbm [shape: f32[4,128], index: 5, kind: output, shape index: {}]  }
   0x1   :  { %v26_v0 = vld [vmem:[%s419_s0 + $0x8] sm:$0xff]  ;;  %v25_v1 = vld [vmem:[%s419_s0] sm:$0xff]  ;;  %314 = vset.pattern.permute.xlu0 %v342_v4  ;;  %v30_v5 = vld [vmem:[%s421_s2 + $0x18] sm:$0xff] }
   0x2   :  { %v21_v2 = vld [vmem:[%s420_s1] sm:$0xff]  ;;  %289 = vmatprep.subr.mxu0 %v26_v0  ;;  %v22_v3 = vld [vmem:[%s420_s1 + $0x8] sm:$0xff]  ;;  %v23_v7 = vld [vmem:[%s420_s1 + $0x10] sm:$0xff]  ;;  %48 = vperm.xlu0 %314, %v30_v5  }
   0x3   :  { %293 = vmatprep.mubr.msk.f32.mxu0 %vm51_vm0, %v21_v2  ;;  %290 = vmatpush3.msra.mxu0 %v26_v0  ;;  %v28_v6 = vld [vmem:[%s421_s2 + $0x8] sm:$0xff] }
   0x4   :  { %291 = vmatprep.subr.mxu0 %v25_v1 }
   0x5   :  { %10 = vsyncpa [#allocation3], 0  ;;  %292 = vmatpush3.msra.mxu0 %v25_v1  ;;  %315 = vset.pattern.permute.xlu1 %v342_v4  ;;  %v29_v8 = vld [vmem:[%s421_s2 + $0x10] sm:$0xff]  ;;  %v24_v9 = vld [vmem:[%s420_s1 + $0x18] sm:$0xff]  ;;  %v343_v12 = vmov 0.0   ;;  %vm344_vm1 = vmmov 0  }
   0x6   :  { %294 = vmatmul.mubr.msk.f32.vlgmr.msra.gmra.mxu0 %vm51_vm0, %v22_v3  ;;  %38 = vperm.xlu1 %315, %v28_v6   ;;  %v27_v10 = vld [vmem:[%s421_s2] sm:$0xff]  ;;  %vm164_vm2 = vcmask 261120   ;;  %vm238_vm3 = vcmask 1043456  }
   0x7   :  { %296 = vmatprep.mubr.msk.f32.mxu0 %vm51_vm0, %v23_v7  ;;  %43 = vperm.xlu0 %314, %v29_v8   ;;  %v158_v11 = vld [vmem:[%s423_s4] sm:$0xf] }
   0x8   :  { %299 = vmatprep.subr.mxu1 %v343_v12  ;;  %307 = vmatprep.mubr.msk.f32.mxu1 %vm344_vm1, %v343_v12  ;;  %v157_v33 = vld [vmem:[%s422_s3] sm:$0xf]  ;;  %s345_s3 = smov [#allocation2]  }
   0x9   :  { %s265_s4 = sshll.u32 %s345_s3, 4  ;;  %s266_s4 = int_to_ptr.vmem [resolvable:$true] %s265_s4 }
   0xa   :  { %297 = vmatmul.mubr.msk.f32.gmra.mxu0 %vm51_vm0, %v24_v9  ;;  %33 = vperm.xlu1 %315, %v27_v10   ;;  %s320_s14 = scalar_lea.vmem %s266_s4, 64  ;;  %p325_p1 = scmp.lt.s32.totalorder %s266_s4, %s266_s4 }
   0xb   :  { %161 = vperm.xlu0 %314, %v158_v11   ;;  %p321_p0 = scmp.ne.s32.totalorder %s266_s4, %s320_s14  ;;  %p326_p2 = scmp.lt.s32.totalorder %s320_s14, %s320_s14 }
   0xd   :  { %p327_p3 = por %p326_p2, %p325_p1 }
   0xf   :  { %p328_p4 = pnand %p327_p3, %p321_p0 }
  0x7d   :  { %v49_v14 = vpop.permute.xlu0 %48 }
  0x81   :  { %v39_v13 = vpop.permute.xlu1 %38 }
  0x82   :  { %v44_v21 = vpop.permute.xlu0 %43 }
  0x85   :  { %v34_v17 = vpop.permute.xlu1 %33 }
  0x86   :  { %v162_v34 = vpop.permute.xlu0 %161 }
  0xc6   :  { %v295_v15 = vpop.f32.mrf.mxu0 }
  0xc7   :  { %v136_v19 = vadd.f32 %v295_v15, %v39_v13 }
  0xc8   :  { %v130_v16 = vpop.f32.mrf.mxu0 }
  0xc9   :  { %v131_v23 = vadd.f32 %v130_v16, %v34_v17  ;;  %v150_v26 = vmul.f32 0.01, %v136_v19 }
  0xca   :  { %v298_v18 = vpop.f32.mrf.mxu0 }
  0xcb   :  { %v146_v20 = vadd.f32 %v298_v18, %v49_v14  ;;  %v149_v29 = vmul.f32 0.01, %v131_v23  ;;  %v154_v31 = vmax.f32 %v136_v19, %v150_v26 }
  0xcc   :  { %v140_v22 = vpop.f32.mrf.mxu0 }
  0xcd   :  { %v152_v24 = vmul.f32 0.01, %v146_v20  ;;  %v141_v25 = vadd.f32 %v140_v22, %v44_v21  ;;  %v153_v32 = vmax.f32 %v131_v23, %v149_v29 }
  0xcf   :  { %v151_v27 = vmul.f32 0.01, %v141_v25  ;;  %v156_v28 = vmax.f32 %v146_v20, %v152_v24 }
  0xd1   :  { %v155_v30 = vmax.f32 %v141_v25, %v151_v27  ;;  %300 = vmatpush3.msra.mxu1 %v156_v28 }
  0xd2   :  { %301 = vmatprep.subr.mxu1 %v343_v12 }
  0xd3   :  { %302 = vmatpush3.msra.mxu1 %v155_v30 }
  0xd4   :  { %303 = vmatprep.subr.mxu1 %v343_v12 }
  0xd5   :  { %304 = vmatpush3.msra.mxu1 %v154_v31 }
  0xd6   :  { %305 = vmatprep.subr.mxu1 %v343_v12 }
  0xd7   :  { %306 = vmatpush3.msra.mxu1 %v153_v32 }
  0xd8   :  { %308 = vmatmul.mubr.msk.f32.vlgmr.msra.gmra.mxu1 %vm164_vm2, %v157_v33 }
 0x198   :  { %v234_v35 = vpop.f32.mrf.mxu1 }
 0x199   :  { %v235_v36 = vadd.f32 %v234_v35, %v162_v34 }
 0x19a   :  { %v309_v37 = vpop.f32.mrf.mxu1 }
 0x19b   :  { %v239_v38 = vsel %vm238_vm3, %v235_v36, -inf }
 0x19c   :  { %v240_v39 = vrot.slane %v239_v38, 4 }
 0x19e   :  { %v241_v40 = vmax.f32 %v239_v38, %v240_v39 }
 0x1a0   :  { %v242_v41 = vrot.slane %v241_v40, 2 }
 0x1a2   :  { %v243_v42 = vmax.f32 %v241_v40, %v242_v41 }
 0x1a4   :  { %v244_v43 = vrot.slane %v243_v42, 1 }
 0x1a6   :  { %v245_v44 = vmax.f32 %v243_v42, %v244_v43 }
 0x1a8   :  { %v246_v45 = vsub.f32 %v235_v36, %v245_v44 }
 0x1aa   :  { %v247_v46 = vmul.f32 1.442695, %v246_v45 }
 0x1ac   :  { %316 = vpow2.f32 %v247_v46 }
 0x1b9   :  { %v317_v47 = vpop.eup %316 }
 0x1ba   :  { %v249_v48 = vsel %vm238_vm3, %v317_v47, 0.0 }
 0x1bb   :  { %v250_v49 = vrot.slane %v249_v48, 4 }
 0x1bd   :  { %v251_v50 = vadd.f32 %v250_v49, %v249_v48 }
 0x1bf   :  { %v252_v51 = vrot.slane %v251_v50, 2 }
 0x1c1   :  { %v253_v52 = vadd.f32 %v252_v51, %v251_v50 }
 0x1c3   :  { %v254_v53 = vrot.slane %v253_v52, 1 }
 0x1c5   :  { %v255_v54 = vadd.f32 %v254_v53, %v253_v52 }
 0x1c7   :  { %318 = vrcp.f32 %v255_v54 }
 0x1d4   :  { %v319_v55 = vpop.eup %318 }
 0x1d5   :  { %v257_v56 = vmul.f32 %v319_v55, %v317_v47 }
 0x1d7   :  { %258 = vst [vmem:[#allocation2] sm:$0xf] %v257_v56 }
 0x1d8   :  { %331 = shalt.err (!%p328_p4)
}
 0x1d9   :  { %268 = dma.vmem_to_hbm [thread:$0]  %s266_s4, 64, %s424_s5, [#allocation3]  }
 0x1da   :  { %340 = dma.done.wait [#allocation3], 64  }
 0x1db   :  { %341 = vsyncadd [#allocation3], 4294967232 }
 0x1dc   :  { %272 = vsyncpa [#allocation3], 1 }

</bundles_post_ra>
